<compile_context>
chip_gen: v5e
topology: v5e:2x2
jax: 0.10.0
libtpu: 0.0.40
codegen_flags: <defaults>
</compile_context>

<pallas_src>
import jax
import jax.numpy as jnp
from jax.experimental import pallas as pl
from jax.experimental.pallas import tpu as pltpu


# ----------------------------------------------------------------------------
# Kernel body
# ----------------------------------------------------------------------------
def _add_param_kernel(p_ref, x_ref, o_ref):
    # p_ref: (1,) parameter in SMEM; x_ref / o_ref: one VMEM tile.
    p = p_ref[0].astype(x_ref.dtype)   # hoisted scalar read + explicit cast
    o_ref[...] = x_ref[...] + p


# ----------------------------------------------------------------------------
# Tiling helpers
# ----------------------------------------------------------------------------
_SMALL_BYTES = 1 << 20           # below this, a single block beats a grid
_LANE_PAD = 8 * 128              # pad non-128-divisible totals to this multiple


def _round_up(n, m):
    return ((n + m - 1) // m) * m


def _round_down(n, m):
    return (n // m) * m


def _best_lane_width(total):
    """Largest multiple of 128 (capped at 4096) that divides `total`."""
    for lanes in (4096, 2048, 1024, 512, 256, 128):
        if total % lanes == 0:
            return lanes
    return None


def _sublane_multiple(dtype):
    """Row-count granularity so packed dtypes keep full, unmasked vregs."""
    itemsize = jnp.dtype(dtype).itemsize
    return max(8, 32 // itemsize)   # f32 -> 8, bf16 -> 16, int8/fp8 -> 32


def _vmem_capacity_bytes():
    """Best-effort trace-time VMEM capacity query; None if unavailable."""
    try:
        info = pltpu.get_tpu_info()
    except Exception:
        return None
    for attr in ("vmem_capacity_bytes", "vmem_bytes", "vmem_capacity"):
        v = getattr(info, attr, None)
        if isinstance(v, int) and v > 0:
            return v
    return None


def _tiling_policy():
    """Return (tile_bytes_target, vmem_limit_bytes_or_None, shape_for_two_cores)."""
    vmem_cap = _vmem_capacity_bytes()
    if vmem_cap is None:
        # Unknown chip: stay under the smallest default scoped limit (16 MiB, v5e).
        # 4x tile footprint = 12 MiB.
        return (3 << 20), None, True
    if vmem_cap <= (64 << 20):
        # v7x-style: 64 MiB physical per TC, 32 MiB default scoped limit,
        # 2 TensorCores per chip. 4x tile footprint = 24 MiB < 32 MiB.
        return (6 << 20), None, True
    # v5e / v6e: 128 MiB physical VMEM. Raise the scoped limit and grow tiles.
    # 4x tile footprint = 32 MiB < 64 MiB raised limit.
    return (8 << 20), (64 << 20), False


# ----------------------------------------------------------------------------
# Forward wrapper
# ----------------------------------------------------------------------------
def tiny_model_forward(x, param):
    """Forward of TinyModel: broadcast-add the 1-element parameter to x."""
    orig_shape = x.shape
    total = x.size
    dtype = x.dtype
    itemsize = jnp.dtype(dtype).itemsize
    nbytes = total * itemsize

    # ---- small inputs: one whole-array block (grid overhead would dominate) ----
    if nbytes <= _SMALL_BYTES:
        lanes = _best_lane_width(total)
        x2d = x.reshape(total // lanes, lanes) if lanes else x.reshape(1, total)
        out2d = pl.pallas_call(
            _add_param_kernel,
            out_shape=jax.ShapeDtypeStruct(x2d.shape, dtype),
            in_specs=[
                pl.BlockSpec(memory_space=pltpu.MemorySpace.SMEM),  # param (1,)
                pl.BlockSpec(x2d.shape, lambda: (0, 0)),            # whole array
            ],
            out_specs=pl.BlockSpec(x2d.shape, lambda: (0, 0)),
        )(param, x2d)
        return out2d.reshape(orig_shape)

    # ---- large inputs: lane-dense slab + 1-D pipelined grid ----
    flat = x.reshape(total)
    lanes = _best_lane_width(total)
    pad = 0
    total_p = total
    if lanes is None:
        # Pad the flat array to a multiple of 8*128 so the lane-dense, tiled,
        # auto-pipelined path is always used (no giant single-block fallback).
        total_p = _round_up(total, _LANE_PAD)
        pad = total_p - total
        flat = jnp.pad(flat, (0, pad))
        lanes = _best_lane_width(total_p)

    rows = total_p // lanes
    sub = _sublane_multiple(dtype)
    tile_target, vmem_limit, two_core_shape = _tiling_policy()

    tm = tile_target // (lanes * itemsize)
    tm = max(sub, _round_down(min(tm, rows), sub))

    if two_core_shape:
        # Keep >= 4 grid steps so each of 2 TensorCores gets >= 2 pipelined
        # steps, and prefer an even step count so both cores finish together.
        max_tm = _round_down(rows // 4, sub)
        if max_tm >= sub:
            tm = min(tm, max_tm)
        steps = pl.cdiv(rows, tm)
        if steps > 1 and steps % 2 == 1:
            tm_even = _round_up(pl.cdiv(rows, steps + 1), sub)
            if sub <= tm_even <= tm and pl.cdiv(rows, tm_even) % 2 == 0:
                tm = tm_even

    x2d = flat.reshape(rows, lanes)

    cp_kwargs = dict(dimension_semantics=("parallel",))  # shard across TCs on v7x
    if vmem_limit is not None:
        cp_kwargs["vmem_limit_bytes"] = vmem_limit

    out2d = pl.pallas_call(
        _add_param_kernel,
        out_shape=jax.ShapeDtypeStruct(x2d.shape, dtype),
        grid=(pl.cdiv(rows, tm),),
        in_specs=[
            pl.BlockSpec(memory_space=pltpu.MemorySpace.SMEM),   # param (1,)
            pl.BlockSpec((tm, lanes), lambda i: (i, 0)),
        ],
        out_specs=pl.BlockSpec((tm, lanes), lambda i: (i, 0)),
        compiler_params=pltpu.CompilerParams(**cp_kwargs),
    )(param, x2d)

    out_flat = out2d.reshape(total_p)
    if pad:
        out_flat = out_flat[:total]
    return out_flat.reshape(orig_shape)


# ----------------------------------------------------------------------------
# Self-test
# ----------------------------------------------------------------------------
if __name__ == "__main__":
    key = jax.random.PRNGKey(0)

    # Deterministic parameter, matching nn.Parameter(torch.tensor([value])) with value=0.5
    value = 0.5
    param = jnp.array([value], dtype=jnp.float32)   # shape (1,)

    # Small NCHW input (single whole-array block path).
    x_small = jax.random.normal(key, (2, 4, 16, 16), dtype=jnp.float32)
    out_small = jax.block_until_ready(tiny_model_forward(x_small, param))
    ref_small = x_small + param
    assert out_small.shape == x_small.shape and out_small.dtype == x_small.dtype
    assert jnp.allclose(out_small, ref_small), "small-shape mismatch vs reference"

    # Larger input to exercise the tiled / pipelined path (32 MiB f32).
    key2 = jax.random.PRNGKey(1)
    x_big = jax.random.normal(key2, (8, 64, 128, 128), dtype=jnp.float32)
    out_big = jax.block_until_ready(tiny_model_forward(x_big, param))
    ref_big = x_big + param
    assert out_big.shape == x_big.shape and out_big.dtype == x_big.dtype
    assert jnp.allclose(out_big, ref_big), "tiled-path mismatch vs reference"

    # Large input whose element count is NOT a multiple of 128 -> padded tiled path.
    key3 = jax.random.PRNGKey(2)
    x_odd = jax.random.normal(key3, (513, 1023), dtype=jnp.float32)   # ~2 MiB, 513*1023 % 128 != 0
    out_odd = jax.block_until_ready(tiny_model_forward(x_odd, param))
    ref_odd = x_odd + param
    assert out_odd.shape == x_odd.shape and out_odd.dtype == x_odd.dtype
    assert jnp.allclose(out_odd, ref_odd), "padded-path mismatch vs reference"

    print("KERNEL_OK")
</pallas_src>

<mosaic_0001>
module attributes {stable_mosaic.version = 11 : i64} {
  func.func @_add_param_kernel(%arg0: memref<1xf32, #tpu.memory_space<smem>>, %arg1: memref<1x2048xf32, #tpu.memory_space<vmem>>, %arg2: memref<1x2048xf32, #tpu.memory_space<vmem>>) attributes {dimension_semantics = [], scalar_prefetch = 0 : i64, scratch_operands = 0 : i64, tpu.core_type = #tpu.core_type<tc>} {
    %c0 = arith.constant 0 : index
    %0 = memref.load %arg0[%c0] : memref<1xf32, #tpu.memory_space<smem>>
    %c0_0 = arith.constant 0 : index
    %c0_1 = arith.constant 0 : index
    %1 = vector.load %arg1[%c0_0, %c0_1] : memref<1x2048xf32, #tpu.memory_space<vmem>>, vector<1x2048xf32>
    %2 = vector.broadcast %0 : f32 to vector<1x2048xf32>
    %3 = arith.addf %1, %2 : vector<1x2048xf32>
    %c0_2 = arith.constant 0 : index
    %c0_3 = arith.constant 0 : index
    %4 = vector.load %arg2[%c0_2, %c0_3] : memref<1x2048xf32, #tpu.memory_space<vmem>>, vector<1x2048xf32>
    tpu.vector_store %arg2[%c0_2, %c0_3], %3 {strides = array<i32>} : memref<1x2048xf32, #tpu.memory_space<vmem>>, vector<1x2048xf32>,
    return
  }
}

</mosaic_0001>

<bundles_post_ra>
// kernel: tpu_custom_call.1
= control target key start
LH: loop header
LB: loop body
LE: loop exit
PB: predicated region body
PF: predicated region fallthrough
CT: control target
= control target key end

     0   :  { %8 = vsyncpa [#allocation4], 0  ;;  %s132_s0 = inlined_call_operand.<no memory space> [shape: f32[1], index: 0, kind: input, shape index: {}]   ;;  %s133_s1 = inlined_call_operand.hbm [shape: f32[1,2048], index: 1, kind: input, shape index: {}]   ;;  %s134_s2 = inlined_call_operand.hbm [shape: f32[1,2048], index: 2, kind: output, shape index: {}]  }
   0x1   :  { %9 = vsyncpa [#allocation5], 0  ;;  %s17_s11 = sshll.u32 %s133_s1, 4  ;;  %s106_s12 = smov [#allocation3]   ;;  %s18_s11 = int_to_ptr.hbm [resolvable:$true] %s17_s11 }
   0x2   :  { %s19_s13 = sshll.u32 %s106_s12, 4  ;;  %s20_s13 = int_to_ptr.vmem [resolvable:$true] %s19_s13 }
   0x3   :  { %22 = dma.hbm_to_vmem [thread:$0]  %s18_s11, 256, %s20_s13, [#allocation4]  }
   0x4   :  { %102 = dma.done.wait [#allocation4], 256  }
   0x5   :  { %103 = vsyncadd [#allocation4], 4294967040  ;;  %v30_v0 = vstv %s132_s0  ;;  %s107_s16 = smov [#allocation6]   ;;  %s42_s20 = sshll.u32 %s134_s2, 4  ;;  %v28_v1 = vld [vmem:[#allocation3] sm:$0xff]  ;;  %v29_v2 = vld [vmem:[#allocation3 + $0x8] sm:$0xff]  ;;  %s43_s20 = int_to_ptr.hbm [resolvable:$true] %s42_s20 }
   0x6   :  { %s40_s17 = sshll.u32 %s107_s16, 4  ;;  %v31_v3 = vadd.f32 %v30_v0, %v28_v1  ;;  %v32_v4 = vadd.f32 %v30_v0, %v29_v2  ;;  %s41_s17 = int_to_ptr.vmem [resolvable:$true] %s40_s17 }
   0x8   :  { %33 = vst [vmem:[#allocation6] sm:$0xff] %v31_v3 }
   0x9   :  { %34 = vst [vmem:[#allocation6 + $0x8] sm:$0xff] %v32_v4 }
   0xa   :  { %45 = dma.vmem_to_hbm [thread:$0]  %s41_s17, 256, %s43_s20, [#allocation5]  }
   0xb   :  { %104 = dma.done.wait [#allocation5], 256  }
   0xc   :  { %105 = vsyncadd [#allocation5], 4294967040 }
   0xd   :  { %50 = vsyncpa [#allocation4], 1 }
   0xe   :  { %51 = vsyncpa [#allocation5], 1 }

</bundles_post_ra>
